<compile_context>
chip_gen: v5e
topology: v5e:2x2
jax: 0.10.0
libtpu: 0.0.40
codegen_flags: <defaults>
</compile_context>

<pallas_src>
import functools

import jax
import jax.numpy as jnp
from jax.experimental import pallas as pl
from jax.experimental.pallas import tpu as pltpu


def _copy_kernel(x_ref, o_ref):
    # Pure copy: the shuffle permutation is expressed in the BlockSpec
    # index_maps, so this kernel is just an HBM<->VMEM copy.
    o_ref[...] = x_ref[...]


def _shuffle_in_kernel(x_ref, o_ref, *, groups, cpg):
    # Fallback: full (C, HW) block per batch element. Permute channels with
    # `groups` static strided-sublane copies (contiguous loads, strided stores)
    # instead of reshape + swapaxes.
    for j in range(groups):
        o_ref[pl.ds(j, cpg, stride=groups), :] = x_ref[j * cpg:(j + 1) * cpg, :]


def _pick_hw_tile(hw, cpg, itemsize, budget_bytes=2 << 20):
    """Largest multiple of 128 that divides hw and keeps one block <= budget."""
    best = 128
    for t in range(128, hw + 1, 128):
        if hw % t == 0 and cpg * t * itemsize <= budget_bytes:
            best = t
    return best


def channel_shuffle(x, groups):
    """x: (N, C, H, W). Returns channel-shuffled array matching the PyTorch module."""
    n, c, h, w = x.shape
    assert c % groups == 0, "channels must be divisible by groups"
    if groups == 1:
        return x
    cpg = c // groups
    hw = h * w

    if hw % 128 == 0:
        # Fast path: permutation is in the index_maps, kernel is a pure copy.
        hw_tile = _pick_hw_tile(hw, cpg, x.dtype.itemsize)
        tiles = hw // hw_tile
        x4 = x.reshape(n, groups, cpg, hw)

        out3 = pl.pallas_call(
            _copy_kernel,
            out_shape=jax.ShapeDtypeStruct((n, cpg, groups * hw), x.dtype),
            grid_spec=pltpu.PrefetchScalarGridSpec(
                num_scalar_prefetch=0,
                grid=(n, groups, tiles),
                in_specs=[
                    # source: channels [r*cpg, (r+1)*cpg), spatial tile t
                    pl.BlockSpec((None, None, cpg, hw_tile),
                                 lambda i, r, t: (i, r, 0, t)),
                ],
                # destination: out3[i, :, r*hw + t*hw_tile : ...]
                out_specs=pl.BlockSpec((None, cpg, hw_tile),
                                       lambda i, r, t: (i, 0, r * tiles + t)),
            ),
            compiler_params=pltpu.CompilerParams(
                dimension_semantics=("parallel", "parallel", "parallel")),
        )(x4)
        # (N, C/g, g*HW) -> (N, C, H, W); out3[i, m, r*hw + p] is channel m*g + r.
        return out3.reshape(n, c, h, w)

    # Fallback: HW not lane-aligned; full per-sample block, strided copies in-kernel.
    x2 = x.reshape(n, c, hw)
    kernel = functools.partial(_shuffle_in_kernel, groups=groups, cpg=cpg)
    out2 = pl.pallas_call(
        kernel,
        out_shape=jax.ShapeDtypeStruct((n, c, hw), x.dtype),
        grid_spec=pltpu.PrefetchScalarGridSpec(
            num_scalar_prefetch=0,
            grid=(n,),
            in_specs=[pl.BlockSpec((None, c, hw), lambda i: (i, 0, 0))],
            out_specs=pl.BlockSpec((None, c, hw), lambda i: (i, 0, 0)),
        ),
        compiler_params=pltpu.CompilerParams(
            dimension_semantics=("parallel",)),
    )(x2)
    return out2.reshape(n, c, h, w)


def channel_shuffle_reference(x, groups):
    """Pure-JAX reference mirroring the PyTorch module."""
    n, c, h, w = x.shape
    xr = x.reshape(n, groups, c // groups, h, w)
    xt = jnp.swapaxes(xr, 1, 2)
    return xt.reshape(n, c, h, w)


if __name__ == "__main__":
    key = jax.random.PRNGKey(0)
    N, C, H, W = 2, 4, 16, 16
    groups = 2

    x = jax.random.normal(key, (N, C, H, W), dtype=jnp.float32)

    out = jax.block_until_ready(channel_shuffle(x, groups))

    ref = channel_shuffle_reference(x, groups)
    assert out.shape == ref.shape and out.dtype == ref.dtype
    assert jnp.array_equal(out, ref), "Pallas ChannelShuffle mismatch vs reference"

    print("KERNEL_OK")
</pallas_src>

<mosaic_0001>
module attributes {stable_mosaic.version = 11 : i64} {
  func.func @_copy_kernel(%arg0: i32, %arg1: i32, %arg2: i32, %arg3: memref<1x1x2x256xf32, #tpu.memory_space<vmem>>, %arg4: memref<1x2x256xf32, #tpu.memory_space<vmem>>) attributes {dimension_semantics = [#tpu.dimension_semantics<parallel>, #tpu.dimension_semantics<parallel>, #tpu.dimension_semantics<parallel>], iteration_bounds = array<i64: 2, 2, 1>, scalar_prefetch = 0 : i64, scratch_operands = 0 : i64, tpu.core_type = #tpu.core_type<tc>, window_params = [{transform_indices = @transform_0, window_bounds = array<i64: 1, 1, 2, 256>}, {transform_indices = @transform_1, window_bounds = array<i64: 1, 2, 256>}]} {
    %c0 = arith.constant 0 : index
    %c0_0 = arith.constant 0 : index
    %c0_1 = arith.constant 0 : index
    %c0_2 = arith.constant 0 : index
    %0 = vector.load %arg3[%c0, %c0_0, %c0_1, %c0_2] : memref<1x1x2x256xf32, #tpu.memory_space<vmem>>, vector<1x1x2x256xf32>
    %1 = vector.shape_cast %0 : vector<1x1x2x256xf32> to vector<2x256xf32>
    %c0_3 = arith.constant 0 : index
    %c0_4 = arith.constant 0 : index
    %c0_5 = arith.constant 0 : index
    %2 = vector.load %arg4[%c0_3, %c0_4, %c0_5] : memref<1x2x256xf32, #tpu.memory_space<vmem>>, vector<1x2x256xf32>
    %3 = vector.shape_cast %2 : vector<1x2x256xf32> to vector<2x256xf32>
    %4 = vector.shape_cast %1 : vector<2x256xf32> to vector<1x2x256xf32>
    tpu.vector_store %arg4[%c0_3, %c0_4, %c0_5], %4 {strides = array<i32>} : memref<1x2x256xf32, #tpu.memory_space<vmem>>, vector<1x2x256xf32>,
    return
  }
  func.func @transform_0(%arg0: i32, %arg1: i32, %arg2: i32) -> (i32, i32, i32, i32) {
    %c0_i32 = arith.constant 0 : i32
    %c0_i32_0 = arith.constant 0 : i32
    return %arg0, %arg1, %c0_i32, %arg2 : i32, i32, i32, i32
  }
  func.func @transform_1(%arg0: i32, %arg1: i32, %arg2: i32) -> (i32, i32, i32) {
    %c1_i32 = arith.constant 1 : i32
    %0 = arith.muli %arg1, %c1_i32 : i32
    %1 = arith.addi %0, %arg2 : i32
    %c0_i32 = arith.constant 0 : i32
    %c0_i32_0 = arith.constant 0 : i32
    return %arg0, %c0_i32, %1 : i32, i32, i32
  }
}

</mosaic_0001>

<bundles_post_ra>
// kernel: tpu_custom_call.1
= control target key start
LH: loop header
LB: loop body
LE: loop exit
PB: predicated region body
PF: predicated region fallthrough
CT: control target
= control target key end

     0   :  { %6 = vsyncpa [#allocation3], 0  ;;  %s661_s0 = inlined_call_operand.hbm [shape: f32[2,2,2,256], index: 0, kind: input, shape index: {}]   ;;  %s662_s1 = inlined_call_operand.hbm [shape: f32[2,2,512], index: 1, kind: output, shape index: {}]  }
   0x1   :  { %8 = vsyncpa [#allocation3 + $0x1], 0 }
   0x2   :  { %9 = vsyncpa [#allocation4], 0 }
   0x3   :  { %11 = vsyncpa [#allocation4 + $0x1], 0  ;;  %s519_s6 = smov 0   ;;  %s521_s7 = smov 0  }
   0x4   :  { %s523_s8 = smov 0   ;;  %s525_s9 = smov 0  }
   0x5   :  { %s527_s10 = smov 0   ;;  %s529_s11 = smov 0  }
   0x6   :  { %s531_s12 = smov 0   ;;  %s533_s13 = smov 0  }
   0x7 LB: > { %s284_s14 = sadd.s32 4294967295, %s507_s13   ;;  %s285_s15 = sadd.s32 4294967294, %s507_s13   ;;  %s507_s13 = sphi %s533_s13, %s17_s13   ;;  %s503_s12 = sphi %s531_s12, %s673_s12   ;;  %s499_s11 = sphi %s529_s11, %s672_s11   ;;  %s495_s10 = sphi %s527_s10, %s671_s10   ;;  %s491_s9 = sphi %s525_s9, %s670_s9   ;;  %s487_s8 = sphi %s523_s8, %s669_s8   ;;  %s483_s7 = sphi %s521_s7, %s668_s7   ;;  %s479_s6 = sphi %s519_s6, %s667_s6  }
   0x8   : > { %s32_s16 = sadd.s32 1, %s499_s11  ;;  %s36_s17 = sadd.s32 1, %s503_s12 }
   0x9   : > { %p34_p0 = scmp.ge.s32.totalorder %s32_s16, 2  ;;  %s47_s18 = sadd.s32 1, %s487_s8 }
   0xa   : > { %p54_p1 = scmp.ne.s32.totalorder %s487_s8, %s483_s7  ;;  %p55_p2 = scmp.eq.s32.totalorder %s507_s13, 0 }
   0xb   : > { %s675_s16 = smov (%p34_p0, %s32_s16), 0  ;;  %s677_s17 = smov (!%p34_p0, %s36_s17), %s503_s12 }
   0xc   : > { %s41_s19 = ssub.s32 %s499_s11, %s675_s16  ;;  %p572_p3 = por %p55_p2, %p54_p1 }
   0xd   : > { %p38_p4 = scmp.ge.s32.totalorder %s677_s17, 2  ;;  %p60_p5 = scmp.ne.s32.totalorder %s483_s7, %s479_s6 }
   0xe   : > { %p61_p6 = scmp.eq.s32.totalorder %s284_s14, 0  ;;  %p88_p7 = scmp.eq.s32.totalorder %s284_s14, 3 }
   0xf   : > { %s679_s17 = smov (%p38_p4, %s677_s17), 0  ;;  %p94_p10 = scmp.eq.s32.totalorder %s285_s15, 3 }
  0x10   : > { %p580_p8 = por %p61_p6, %p60_p5  ;;  %p584_p9 = por %p88_p7, %p54_p1 }
  0x11   : > { %s40_s23 = ssub.s32 %s503_s12, %s679_s17  ;;  %p590_p12 = por %p94_p10, %p60_p5 }
  0x12   : > { %s42_s24 = sor.u32 %s41_s19, %s40_s23  ;;  %p313_p13 = scmp.lt.s32.totalorder %s507_s13, 4 }
  0x13   : > { %p45_p11 = scmp.eq.s32.totalorder %s42_s24, 0  ;;  %s114_s26 = sand.u32 1, %s487_s8  }
  0x14   : > { %s288_s28 = sshll.u32 %s114_s26, 2  ;;  %s289_s29 = sshll.u32 %s499_s11, 1 }
  0x15   : > { %s597_s27 = scalar_select %p45_p11, %s487_s8, %s47_s18  }
  0x16   : > { %s290_s30 = sshll.u32 %s503_s12, 2  ;;  %s118_s2 = scalar_lea.vmem [#allocation2], %s288_s28 }
  0x17   : > { %s131_s3 = sshll.u32 %s118_s2, 4  ;;  %s125_s4 = sadd.s32 %s290_s30, %s289_s29  ;;  %s132_s3 = int_to_ptr.vmem [resolvable:$true] %s131_s3 }
  0x18   : > { %s291_s5 = sshll.u32 %s125_s4, 1  ;;  %p306_p0 = pnand %p313_p13, %p572_p3 }
  0x19   : > { %s127_s19 = scalar_lea.hbm %s661_s0, %s291_s5  ;;  %p292_p1 = scmp.ge.s32.totalorder %s507_s13, 1 }
  0x1a   : > { %s129_s23 = sshll.u32 %s127_s19, 4  ;;  %p136_p2 = scmp.lt.s32.totalorder %s507_s13, 5  ;;  %s130_s23 = int_to_ptr.hbm [resolvable:$true] %s129_s23 }
  0x1b   : > { %s115_s18 = scalar_lea.sflag [#allocation3], %s114_s26 }
  0x1c   : > { %308 = dma.hbm_to_vmem [thread:$0]  (!%p306_p0), %s130_s23, 64, %s132_s3, %s115_s18  }
  0x1d   : > { %p137_p4 = pnand %p292_p1, %p136_p2 }
  0x1e   : > { %s609_s24 = sand.u32 (!%p137_p4), 1, %s483_s7  }
  0x1f   : > { %140 = sbr.rel (%p137_p4) target bundleno = 54 (0x36), region = 24  ;;  %s293_s20 = sshll.u32 (!%p137_p4), %s609_s24, 2 }
  0x20   : > { %s143_s28 = scalar_lea.sflag (!%p137_p4), [#allocation3], %s609_s24  ;;  %s146_s29 = scalar_lea.vmem (!%p137_p4), [#allocation2], %s293_s20 }
  0x24   : > { %470 = dma.done.wait (%p580_p8), %s143_s28, 64  }
  0x25   : > { %472 = vsyncadd (%p580_p8), %s143_s28, 4294967232  ;;  %s296_s26 = sshll.u32 %s491_s9, 1  ;;  %s297_s30 = sshll.u32 %s495_s10, 2  ;;  %v169_v0 = vld [vmem:[%s146_s29] sm:$0xf] }
  0x26   : > { %s165_s2 = scalar_lea.vmem [#allocation5], %s293_s20  ;;  %s184_s4 = sadd.s32 %s297_s30, %s296_s26 }
  0x27   : > { %s188_s3 = sshll.u32 %s165_s2, 4  ;;  %s298_s5 = sshll.u32 %s184_s4, 1  ;;  %170 = vst [vmem:[%s165_s2] sm:$0xf] %v169_v0  ;;  %s189_s3 = int_to_ptr.vmem [resolvable:$true] %s188_s3 }
  0x28   : > { %s186_s19 = scalar_lea.hbm %s662_s1, %s298_s5  ;;  %s172_s21 = scalar_lea.sflag [#allocation4], %s609_s24 }
  0x29   : > { %s190_s23 = sshll.u32 %s186_s19, 4  ;;  %s429_s20 = scalar_lea.hbm %s662_s1, 16  ;;  %s191_s23 = int_to_ptr.hbm [resolvable:$true] %s190_s23 }
  0x2a   : > { %s423_s18 = sshra.s32 %s191_s23, 4  ;;  %s424_s18 = int_to_ptr.hbm [resolvable:$true] %s423_s18 }
  0x2b   : > { %s425_s28 = scalar_lea.hbm %s424_s18, 4  ;;  %p430_p7 = scmp.lt.s32.totalorder %s424_s18, %s662_s1 }
  0x2c   : > { %p426_p3 = scmp.ne.s32.totalorder %s424_s18, %s425_s28  ;;  %p431_p8 = scmp.lt.s32.totalorder %s429_s20, %s425_s28 }
  0x2e   : > { %p427_p5 = pnand %p426_p3, %p584_p9  ;;  %p432_p10 = por %p431_p8, %p430_p7 }
  0x30   : > { %p428_p6 = pneg %p427_p5 }
  0x32   : > { %p433_p11 = pnand %p432_p10, %p428_p6 }
  0x34   : > { %436 = shalt.err (!%p433_p11)
}
  0x35   : > { %303 = dma.vmem_to_hbm [thread:$0]  (%p584_p9), %s189_s3, 64, %s191_s23, %s172_s21  }
  0x36 PF: > { %p314_p13 = scmp.ge.s32.totalorder %s507_s13, 2  ;;  %s202_s24 = sand.u32 1, %s479_s6  }
  0x37   : > { %s203_s29 = scalar_lea.sflag [#allocation4], %s202_s24 }
  0x38   : > { %p310_p0 = pnand %p314_p13, %p590_p12 }
  0x3a   : > { %p311_p1 = pneg %p310_p0 }
  0x3c   : > { %474 = dma.done.wait (%p311_p1), %s203_s29, 64  }
  0x3d   : > { %476 = vsyncadd (%p311_p1), %s203_s29, 4294967232  ;;  %s17_s13 = sadd.s32 1, %s507_s13   ;;  %s667_s6 = smov %s483_s7 }
  0x3e   : > { %p14_p2 = scmp.ge.s32.totalorder %s17_s13, 6   ;;  %s668_s7 = smov %s487_s8 }
  0x3f   : > { %s669_s8 = smov %s597_s27  ;;  %s670_s9 = smov %s499_s11 }
  0x40   : > { %s671_s10 = smov %s503_s12  ;;  %s672_s11 = smov %s675_s16 }
  0x41   : > { %s673_s12 = smov %s679_s17  ;;  %16 = sbr.rel (!%p14_p2) target bundleno = 7 (0x7), region = 69 }
  0x46   :  { %209 = vsyncpa [#allocation3], 1 }
  0x47   :  { %211 = vsyncpa [#allocation3 + $0x1], 1 }
  0x48   :  { %212 = vsyncpa [#allocation4], 1 }
  0x49   :  { %214 = vsyncpa [#allocation4 + $0x1], 1 }

</bundles_post_ra>
